<compile_context>
chip_gen: v7x
topology: tpu7x:2x2x1
jax: 0.10.0
libtpu: 0.0.40
codegen_flags: <defaults>
</compile_context>

<pallas_src>
import functools

import jax
import jax.numpy as jnp
from jax.experimental import pallas as pl
from jax.experimental.pallas import tpu as pltpu

# ------------------------- config (mirrors module __init__) -------------------------
NUM_CLASSES = 4          # num_classes (background + 3 fg classes)
OVERLAP_THRESH = 0.5     # overlap_thresh
NEGPOS_RATIO = 3.0       # neg_pos
VARIANCES = (0.1, 0.2)   # cfg['variance']
LANES = 128              # TPU lane width


# ------------------------- plain-JAX matching glue (match_offset) --------------------
def _point_form(priors):
    return jnp.concatenate(
        [priors[:, :2] - priors[:, 2:] / 2.0, priors[:, :2] + priors[:, 2:] / 2.0], axis=1
    )


def _jaccard(box_a, box_b):
    max_xy = jnp.minimum(box_a[:, None, 2:], box_b[None, :, 2:])
    min_xy = jnp.maximum(box_a[:, None, :2], box_b[None, :, :2])
    inter_wh = jnp.clip(max_xy - min_xy, 0.0, None)
    inter = inter_wh[..., 0] * inter_wh[..., 1]
    area_a = ((box_a[:, 2] - box_a[:, 0]) * (box_a[:, 3] - box_a[:, 1]))[:, None]
    area_b = ((box_b[:, 2] - box_b[:, 0]) * (box_b[:, 3] - box_b[:, 1]))[None, :]
    return inter / (area_a + area_b - inter)


def _match_one(truths9, labels, priors, threshold, variances):
    """Per-image matching + encoding (match_offset).

    truths9 columns: [xmin, ymin, xmax, ymax, has_lp, lp_w, lp_h, lp_cx, lp_cy]
    Returns channels-first targets (8, P) so no wrapper transpose is needed.
    """
    boxes = truths9[:, :4]
    has_lp = truths9[:, 4]
    lp_size = truths9[:, 5:7]
    lp_cxy = truths9[:, 7:9]
    num_priors = priors.shape[0]
    num_objs = boxes.shape[0]

    overlaps = _jaccard(boxes, _point_form(priors))              # (O, P)
    best_prior_idx = jnp.argmax(overlaps, axis=1)                # (O,)
    best_truth_overlap = jnp.max(overlaps, axis=0)               # (P,)
    best_truth_idx = jnp.argmax(overlaps, axis=0)                # (P,)
    # ensure every GT keeps its best prior (index_fill_ with 2, then idx overwrite).
    best_truth_overlap = best_truth_overlap.at[best_prior_idx].set(2.0)
    # Last-write-wins for duplicate best_prior_idx, matching PyTorch's sequential loop
    # (largest j wins == scatter-max of the GT index).
    forced = jnp.full((num_priors,), -1, jnp.int32).at[best_prior_idx].max(
        jnp.arange(num_objs, dtype=jnp.int32))
    best_truth_idx = jnp.where(forced >= 0, forced, best_truth_idx)

    m_box = boxes[best_truth_idx]                                # (P, 4)
    m_has = has_lp[best_truth_idx]                               # (P,)
    m_size = lp_size[best_truth_idx]                             # (P, 2)
    m_off = lp_cxy[best_truth_idx]                               # (P, 2)
    conf = labels[best_truth_idx].astype(jnp.int32) + 1
    conf = jnp.where(best_truth_overlap < threshold, 0, conf)

    # encode(matched, priors, variances); degenerate GT boxes may yield -inf/NaN here,
    # the kernel's where-based masking keeps them from poisoning the sums when the
    # prior is not positive.
    g_cxcy = (m_box[:, :2] + m_box[:, 2:]) / 2.0 - priors[:, :2]
    g_cxcy = g_cxcy / (variances[0] * priors[:, 2:])
    g_wh = (m_box[:, 2:] - m_box[:, :2]) / priors[:, 2:]
    g_wh = jnp.log(g_wh) / variances[1]

    # TODO(synk): exact match_offset encoding not provided in the spec; assume
    # size_lp encoded relative to prior wh and offset relative to prior center.
    size_t = m_size / priors[:, 2:]
    off_t = (m_off - priors[:, :2]) / (variances[0] * priors[:, 2:])

    targ8 = jnp.concatenate(
        [g_cxcy.T, g_wh.T, size_t.T, off_t.T], axis=0)           # (8, P) channels-first
    has_t = m_has.astype(jnp.int32)
    return targ8, conf, has_t


# ------------------------- Pallas kernel: per-image masked loss reductions -----------
def _multibox_loss_offset_kernel(locp_ref, sizep_ref, offp_ref, targ_ref, aux_ref,
                                 out_ref, acc_ref, *,
                                 nsplit, tiles_per_split, tile, num_priors):
    bs = pl.program_id(0)                       # batch (x optional split) index
    k = pl.program_id(1)                        # P-tile index within this split

    @pl.when(k == 0)
    def _():
        acc_ref[...] = jnp.zeros_like(acc_ref)

    # Logical P-tile this step covers; the batch-split / ragged tail may over-run the
    # prior axis -- those lanes are zeroed by the validity mask below.
    if nsplit == 1:
        logical_tile = k
    else:
        logical_tile = (bs % nsplit) * tiles_per_split + k
    lane = jax.lax.broadcasted_iota(jnp.int32, (1, tile), 1)
    valid = (logical_tile * tile + lane) < num_priors            # (1, tile) bool

    pos = (aux_ref[0:1, :] > 0.0) & valid                        # positive priors
    poslp = (aux_ref[1:2, :] > 0.0) & valid                      # positive & has_lp
    sel = (aux_ref[2:3, :] > 0.0) & valid                        # pos | hard-mined neg
    hlp_x = aux_ref[3:4, :]                                      # has_lp logit
    hlp_t = aux_ref[4:5, :]                                      # has_lp target (0/1)
    lc = aux_ref[5:6, :]                                         # precomputed CE per prior

    def sl1(d):
        ad = jnp.abs(d)
        return jnp.where(ad < 1.0, 0.5 * d * d, ad - 0.5)

    # jnp.where (select), NOT mask-multiply: NaN/Inf in masked-out targets cannot
    # propagate into the sums.
    l_loc = jnp.sum(jnp.where(pos, sl1(locp_ref[...] - targ_ref[0:4, :]), 0.0))
    l_size = jnp.sum(jnp.where(poslp, sl1(sizep_ref[...] - targ_ref[4:6, :]), 0.0))
    l_off = jnp.sum(jnp.where(poslp, sl1(offp_ref[...] - targ_ref[6:8, :]), 0.0))

    # cross-entropy term reuses the wrapper's logsumexp (no per-class loop in-kernel)
    l_c = jnp.sum(jnp.where(sel, lc, 0.0))

    # binary_cross_entropy(sigmoid(x), t) == softplus(x) - t*x (stable form)
    bce = (jnp.maximum(hlp_x, 0.0) - hlp_x * hlp_t
           + jnp.log(1.0 + jnp.exp(-jnp.abs(hlp_x))))
    l_hlp = jnp.sum(jnp.where(sel, bce, 0.0))
    n_pos = jnp.sum(jnp.where(pos, 1.0, 0.0))

    # Pack the six partial sums into one lane-dense (8, 128) slab and accumulate.
    # (Kept as a vreg-shaped slab rather than SMEM scalars for robust lowering; the
    #  six selects run once per tile and are negligible vs. the tile's HBM traffic.)
    rid = jax.lax.broadcasted_iota(jnp.int32, (8, LANES), 0)
    acc_ref[...] += jnp.where(rid == 0, l_loc,
                    jnp.where(rid == 1, l_c,
                    jnp.where(rid == 2, l_size,
                    jnp.where(rid == 3, l_off,
                    jnp.where(rid == 4, l_hlp,
                    jnp.where(rid == 5, n_pos, 0.0))))))
    out_ref[...] = acc_ref[...]


def multibox_loss_offset(loc_data, conf_data, priors, has_lp_data, size_lp_data,
                         offset_data, targets, *,
                         num_classes=NUM_CLASSES, threshold=OVERLAP_THRESH,
                         variances=VARIANCES, negpos_ratio=NEGPOS_RATIO,
                         tile_p=2048):
    B, P, C = conf_data.shape
    assert C == num_classes
    priors = priors[:P, :]

    # ---- GT<->prior matching (plain JAX glue), targets produced channels-first ----
    truths = targets[..., :-1]                                   # (B, O, 9)
    labels = targets[..., -1]                                    # (B, O)
    targ8, conf_t, has_lp_t = jax.vmap(
        lambda t, l: _match_one(t, l, priors, threshold, variances))(truths, labels)
    # targ8: (B, 8, P)   conf_t: (B, P) int32   has_lp_t: (B, P) int32

    # ---- hard-negative mining: one argsort + inverse-permutation scatter ----
    pos = conf_t > 0                                             # (B, P)
    lse = jax.scipy.special.logsumexp(conf_data, axis=-1)
    conf_gather = jnp.take_along_axis(conf_data, conf_t[..., None], axis=-1)[..., 0]
    lc_all = lse - conf_gather                                   # per-prior CE (reused by kernel)
    lc_mined = jnp.where(pos, 0.0, lc_all)
    loss_idx = jnp.argsort(-lc_mined, axis=1)                    # descending
    idx_rank = jnp.zeros((B, P), jnp.int32).at[
        jnp.arange(B)[:, None], loss_idx].set(
        jnp.broadcast_to(jnp.arange(P, dtype=jnp.int32), (B, P)))
    num_pos = pos.sum(axis=1)
    num_neg = jnp.minimum(negpos_ratio * num_pos.astype(jnp.float32), float(P - 1))
    neg = idx_rank.astype(jnp.float32) < num_neg[:, None]        # (B, P) bool

    # ---- lane-dense kernel inputs: prior axis last; no concat, no pad ----
    loc_p = jnp.transpose(loc_data, (0, 2, 1))                   # (B, 4, P)
    size_p = jnp.transpose(size_lp_data, (0, 2, 1))              # (B, 2, P)
    off_p = jnp.transpose(offset_data, (0, 2, 1))                # (B, 2, P)
    aux = jnp.stack([pos.astype(jnp.float32),
                     (pos & (has_lp_t > 0)).astype(jnp.float32),
                     (pos | neg).astype(jnp.float32),
                     has_lp_data[..., 0],
                     has_lp_t.astype(jnp.float32),
                     lc_all], axis=1)                            # (B, 6, P)

    # ---- grid: (batch [x optional split], P tiles); tiny VMEM footprint per step ----
    if P <= tile_p:
        tile = P                              # full-extent last dim (no (8,128) rule)
    else:
        assert tile_p % LANES == 0
        tile = tile_p
    n_tiles = pl.cdiv(P, tile)
    # Feed both v7x TensorCores when the parallel (batch) axis is 1 or odd.
    nsplit = 2 if (B % 2 == 1 and n_tiles >= 2) else 1
    tiles_per_split = pl.cdiv(n_tiles, nsplit)

    def in_map(bs, k):
        if nsplit == 1:
            return (bs, 0, k)
        t = jnp.minimum((bs % nsplit) * tiles_per_split + k, n_tiles - 1)  # clamp over-run
        return (bs // nsplit, 0, t)

    kernel = functools.partial(_multibox_loss_offset_kernel,
                               nsplit=nsplit, tiles_per_split=tiles_per_split,
                               tile=tile, num_priors=P)
    sq = pl.Squeezed()
    parts = pl.pallas_call(
        kernel,
        out_shape=jax.ShapeDtypeStruct((B * nsplit, 8, LANES), jnp.float32),
        grid_spec=pltpu.PrefetchScalarGridSpec(
            num_scalar_prefetch=0,
            grid=(B * nsplit, tiles_per_split),
            in_specs=[
                pl.BlockSpec((sq, 4, tile), in_map),             # loc preds
                pl.BlockSpec((sq, 2, tile), in_map),             # size_lp preds
                pl.BlockSpec((sq, 2, tile), in_map),             # offset preds
                pl.BlockSpec((sq, 8, tile), in_map),             # matched targets
                pl.BlockSpec((sq, 6, tile), in_map),             # masks / logits / CE
            ],
            out_specs=pl.BlockSpec((sq, 8, LANES), lambda bs, k: (bs, 0, 0)),
            scratch_shapes=[pltpu.VMEM((8, LANES), jnp.float32)],
        ),
        compiler_params=pltpu.CompilerParams(
            dimension_semantics=("parallel", "arbitrary")),
    )(loc_p, size_p, off_p, targ8, aux)

    sums = jnp.sum(parts[:, :, 0], axis=0)                       # (8,)
    # TODO(synk): PyTorch casts to float64 before the final divide; TPU keeps float32.
    N = jnp.maximum(sums[5], 1.0)                                # guard N==0
    return sums[0] / N, sums[1] / N, sums[2] / N, sums[3] / N, sums[4] / N


# ------------------------- pure-JAX reference (for self-check) ------------------------
def _ref_losses(loc_data, conf_data, has_lp_data, size_lp_data, offset_data,
                targ8, conf_t, has_lp_t, negpos_ratio):
    B, P, C = conf_data.shape
    loc_t = jnp.transpose(targ8[:, 0:4, :], (0, 2, 1))
    size_lp_t = jnp.transpose(targ8[:, 4:6, :], (0, 2, 1))
    offset_t = jnp.transpose(targ8[:, 6:8, :], (0, 2, 1))
    pos = conf_t > 0

    def sl1(d):
        ad = jnp.abs(d)
        return jnp.where(ad < 1.0, 0.5 * d * d, ad - 0.5)

    loss_l = jnp.sum(jnp.where(pos[..., None], sl1(loc_data - loc_t), 0.0))
    poslp = (pos & (has_lp_t > 0))[..., None]
    loss_size = jnp.sum(jnp.where(poslp, sl1(size_lp_data - size_lp_t), 0.0))
    loss_off = jnp.sum(jnp.where(poslp, sl1(offset_data - offset_t), 0.0))

    lse = jax.scipy.special.logsumexp(conf_data, axis=-1)
    conf_gt = jnp.take_along_axis(conf_data, conf_t[..., None], axis=-1)[..., 0]
    lc_all = lse - conf_gt
    lc_mined = jnp.where(pos, 0.0, lc_all)
    loss_idx = jnp.argsort(-lc_mined, axis=1)
    idx_rank = jnp.argsort(loss_idx, axis=1)                     # PyTorch double argsort
    num_pos = pos.sum(axis=1)
    num_neg = jnp.minimum(negpos_ratio * num_pos.astype(jnp.float32), float(P - 1))
    neg = idx_rank.astype(jnp.float32) < num_neg[:, None]
    sel = pos | neg
    loss_c = jnp.sum(jnp.where(sel, lc_all, 0.0))

    x = has_lp_data[..., 0]
    t = has_lp_t.astype(jnp.float32)
    bce = jnp.maximum(x, 0.0) - x * t + jnp.log(1.0 + jnp.exp(-jnp.abs(x)))
    loss_hlp = jnp.sum(jnp.where(sel, bce, 0.0))

    N = jnp.maximum(num_pos.sum().astype(jnp.float32), 1.0)
    return loss_l / N, loss_c / N, loss_size / N, loss_off / N, loss_hlp / N


# ------------------------- demo ------------------------------------------------------
if __name__ == "__main__":
    key = jax.random.PRNGKey(0)
    B, P, C, O = 2, 640, NUM_CLASSES, 3      # P=640, tile_p=256 -> ragged last tile

    k = jax.random.split(key, 12)
    loc_data = 0.1 * jax.random.normal(k[0], (B, P, 4), jnp.float32)
    conf_data = jax.random.normal(k[1], (B, P, C), jnp.float32)
    has_lp_data = 0.5 * jax.random.normal(k[2], (B, P, 1), jnp.float32)
    size_lp_data = 0.1 * jax.random.normal(k[3], (B, P, 2), jnp.float32)
    offset_data = 0.1 * jax.random.normal(k[4], (B, P, 2), jnp.float32)

    # priors in center form (cx, cy, w, h)
    prior_cxy = jax.random.uniform(k[5], (P, 2), jnp.float32, 0.2, 0.8)
    prior_wh = jax.random.uniform(k[6], (P, 2), jnp.float32, 0.1, 0.3)
    priors = jnp.concatenate([prior_cxy, prior_wh], axis=1)

    # targets: (B, O, 10) = [xmin,ymin,xmax,ymax, has_lp, lp_w,lp_h, lp_cx,lp_cy, label]
    gt_cxy = jax.random.uniform(k[7], (B, O, 2), jnp.float32, 0.3, 0.7)
    gt_wh = jax.random.uniform(k[8], (B, O, 2), jnp.float32, 0.1, 0.4)
    boxes = jnp.concatenate([gt_cxy - gt_wh / 2.0, gt_cxy + gt_wh / 2.0], axis=-1)
    has_lp = jax.random.bernoulli(k[9], 0.7, (B, O, 1)).astype(jnp.float32)
    lp_wh = 0.2 * gt_wh
    lp_cxy = gt_cxy
    labels = jax.random.randint(k[10], (B, O, 1), 0, C - 1).astype(jnp.float32)
    targets = jnp.concatenate([boxes, has_lp, lp_wh, lp_cxy, labels], axis=-1)

    fn = jax.jit(functools.partial(multibox_loss_offset, tile_p=256))
    losses = fn(loc_data, conf_data, priors, has_lp_data, size_lp_data,
                offset_data, targets)
    jax.block_until_ready(losses)

    # self-check against a pure-JAX reference of the same math
    tr, la = targets[..., :-1], targets[..., -1]
    targ8, conf_t, haslp_t = jax.vmap(
        lambda t, l: _match_one(t, l, priors, OVERLAP_THRESH, VARIANCES))(tr, la)
    refs = _ref_losses(loc_data, conf_data, has_lp_data, size_lp_data, offset_data,
                       targ8, conf_t, haslp_t, NEGPOS_RATIO)
    for got, want in zip(losses, refs):
        assert jnp.allclose(got, want, rtol=1e-4, atol=1e-5), (got, want)

    # also exercise the odd-batch path (nsplit=2, clamped over-run tile on v7x megacore)
    losses1 = fn(loc_data[:1], conf_data[:1], priors, has_lp_data[:1],
                 size_lp_data[:1], offset_data[:1], targets[:1])
    jax.block_until_ready(losses1)
    refs1 = _ref_losses(loc_data[:1], conf_data[:1], has_lp_data[:1],
                        size_lp_data[:1], offset_data[:1],
                        targ8[:1], conf_t[:1], haslp_t[:1], NEGPOS_RATIO)
    for got, want in zip(losses1, refs1):
        assert jnp.allclose(got, want, rtol=1e-4, atol=1e-5), (got, want)

    print("KERNEL_OK")
</pallas_src>

<mosaic_0001>
module attributes {stable_mosaic.version = 11 : i64} {
  func.func private @main(%arg0: i32) attributes {dimension_semantics = [#tpu.dimension_semantics<core_parallel>], iteration_bounds = array<i64: 2>, tpu.core_type = #tpu.core_type<sc_scalar_subcore>, window_params = []} {
    return
  }
}

module attributes {stable_mosaic.version = 11 : i64} {
  func.func private @main(%arg0: i32) attributes {dimension_semantics = [#tpu.dimension_semantics<core_parallel>], iteration_bounds = array<i64: 2>, tpu.core_type = #tpu.core_type<sc_scalar_subcore>, window_params = []} {
    return
  }
}

module attributes {stable_mosaic.version = 11 : i64} {
  func.func @_multibox_loss_offset_kernel(%arg0: i32, %arg1: i32, %arg2: memref<1x4x256xf32, #tpu.memory_space<vmem>>, %arg3: memref<1x2x256xf32, #tpu.memory_space<vmem>>, %arg4: memref<1x2x256xf32, #tpu.memory_space<vmem>>, %arg5: memref<1x8x256xf32, #tpu.memory_space<vmem>>, %arg6: memref<1x6x256xf32, #tpu.memory_space<vmem>>, %arg7: memref<1x8x128xf32, #tpu.memory_space<vmem>>, %arg8: memref<8x128xf32, #tpu.memory_space<vmem>>) attributes {dimension_semantics = [#tpu.dimension_semantics<parallel>, #tpu.dimension_semantics<arbitrary>], iteration_bounds = array<i64: 2, 3>, scalar_prefetch = 0 : i64, scratch_operands = 1 : i64, tpu.core_type = #tpu.core_type<tc>, window_params = [{transform_indices = @transform_0, window_bounds = array<i64: 1, 4, 256>}, {transform_indices = @transform_1, window_bounds = array<i64: 1, 2, 256>}, {transform_indices = @transform_2, window_bounds = array<i64: 1, 2, 256>}, {transform_indices = @transform_3, window_bounds = array<i64: 1, 8, 256>}, {transform_indices = @transform_4, window_bounds = array<i64: 1, 6, 256>}, {transform_indices = @transform_5, window_bounds = array<i64: 1, 8, 128>}]} {
    %c0_i32 = arith.constant 0 : i32
    %0 = arith.cmpi eq, %arg1, %c0_i32 : i32
    %1 = arith.extui %0 : i1 to i32
    %c0_i32_0 = arith.constant 0 : i32
    %2 = arith.cmpi ne, %1, %c0_i32_0 : i32
    scf.if %2 {
      %cst_68 = arith.constant 0.000000e+00 : f32
      %160 = vector.broadcast %cst_68 : f32 to vector<8x128xf32>
      %c0_69 = arith.constant 0 : index
      %c0_70 = arith.constant 0 : index
      %161 = vector.load %arg8[%c0_69, %c0_70] : memref<8x128xf32, #tpu.memory_space<vmem>>, vector<8x128xf32>
      tpu.vector_store %arg8[%c0_69, %c0_70], %160 {strides = array<i32>} : memref<8x128xf32, #tpu.memory_space<vmem>>, vector<8x128xf32>,
    } else {
    }
    %3 = tpu.iota {dimensions = array<i32: 1>} : vector<1x256xi32>
    %c256_i32 = arith.constant 256 : i32
    %4 = arith.muli %arg1, %c256_i32 : i32
    %5 = vector.broadcast %4 : i32 to vector<1x256xi32>
    %6 = arith.addi %5, %3 : vector<1x256xi32>
    %c640_i32 = arith.constant 640 : i32
    %7 = vector.broadcast %c640_i32 : i32 to vector<1x256xi32>
    %8 = arith.cmpi slt, %6, %7 : vector<1x256xi32>
    %c0 = arith.constant 0 : index
    %c0_1 = arith.constant 0 : index
    %c0_2 = arith.constant 0 : index
    %9 = vector.load %arg6[%c0, %c0_1, %c0_2] : memref<1x6x256xf32, #tpu.memory_space<vmem>>, vector<1x1x256xf32>
    %10 = vector.shape_cast %9 : vector<1x1x256xf32> to vector<1x256xf32>
    %cst = arith.constant 0.000000e+00 : f32
    %11 = vector.broadcast %cst : f32 to vector<1x256xf32>
    %12 = arith.cmpf ogt, %10, %11 : vector<1x256xf32>
    %13 = arith.andi %12, %8 : vector<1x256xi1>
    %c0_3 = arith.constant 0 : index
    %c1 = arith.constant 1 : index
    %c0_4 = arith.constant 0 : index
    %14 = vector.load %arg6[%c0_3, %c1, %c0_4] : memref<1x6x256xf32, #tpu.memory_space<vmem>>, vector<1x1x256xf32>
    %15 = vector.shape_cast %14 : vector<1x1x256xf32> to vector<1x256xf32>
    %cst_5 = arith.constant 0.000000e+00 : f32
    %16 = vector.broadcast %cst_5 : f32 to vector<1x256xf32>
    %17 = arith.cmpf ogt, %15, %16 : vector<1x256xf32>
    %18 = arith.andi %17, %8 : vector<1x256xi1>
    %c0_6 = arith.constant 0 : index
    %c2 = arith.constant 2 : index
    %c0_7 = arith.constant 0 : index
    %19 = vector.load %arg6[%c0_6, %c2, %c0_7] : memref<1x6x256xf32, #tpu.memory_space<vmem>>, vector<1x1x256xf32>
    %20 = vector.shape_cast %19 : vector<1x1x256xf32> to vector<1x256xf32>
    %cst_8 = arith.constant 0.000000e+00 : f32
    %21 = vector.broadcast %cst_8 : f32 to vector<1x256xf32>
    %22 = arith.cmpf ogt, %20, %21 : vector<1x256xf32>
    %23 = arith.andi %22, %8 : vector<1x256xi1>
    %c0_9 = arith.constant 0 : index
    %c3 = arith.constant 3 : index
    %c0_10 = arith.constant 0 : index
    %24 = vector.load %arg6[%c0_9, %c3, %c0_10] : memref<1x6x256xf32, #tpu.memory_space<vmem>>, vector<1x1x256xf32>
    %25 = vector.shape_cast %24 : vector<1x1x256xf32> to vector<1x256xf32>
    %c0_11 = arith.constant 0 : index
    %c4 = arith.constant 4 : index
    %c0_12 = arith.constant 0 : index
    %26 = vector.load %arg6[%c0_11, %c4, %c0_12] : memref<1x6x256xf32, #tpu.memory_space<vmem>>, vector<1x1x256xf32>
    %27 = vector.shape_cast %26 : vector<1x1x256xf32> to vector<1x256xf32>
    %c0_13 = arith.constant 0 : index
    %c5 = arith.constant 5 : index
    %c0_14 = arith.constant 0 : index
    %28 = vector.load %arg6[%c0_13, %c5, %c0_14] : memref<1x6x256xf32, #tpu.memory_space<vmem>>, vector<1x1x256xf32>
    %29 = vector.shape_cast %28 : vector<1x1x256xf32> to vector<1x256xf32>
    %c0_15 = arith.constant 0 : index
    %c0_16 = arith.constant 0 : index
    %c0_17 = arith.constant 0 : index
    %30 = vector.load %arg2[%c0_15, %c0_16, %c0_17] : memref<1x4x256xf32, #tpu.memory_space<vmem>>, vector<1x4x256xf32>
    %31 = vector.shape_cast %30 : vector<1x4x256xf32> to vector<4x256xf32>
    %c0_18 = arith.constant 0 : index
    %c0_19 = arith.constant 0 : index
    %c0_20 = arith.constant 0 : index
    %32 = vector.load %arg5[%c0_18, %c0_19, %c0_20] : memref<1x8x256xf32, #tpu.memory_space<vmem>>, vector<1x4x256xf32>
    %33 = vector.shape_cast %32 : vector<1x4x256xf32> to vector<4x256xf32>
    %34 = arith.subf %31, %33 : vector<4x256xf32>
    %35 = math.absf %34 : vector<4x256xf32>
    %cst_21 = arith.constant 1.000000e+00 : f32
    %36 = vector.broadcast %cst_21 : f32 to vector<4x256xf32>
    %37 = arith.cmpf olt, %35, %36 : vector<4x256xf32>
    %cst_22 = arith.constant 5.000000e-01 : f32
    %38 = vector.broadcast %cst_22 : f32 to vector<4x256xf32>
    %39 = arith.mulf %38, %34 : vector<4x256xf32>
    %40 = arith.mulf %39, %34 : vector<4x256xf32>
    %cst_23 = arith.constant 5.000000e-01 : f32
    %41 = vector.broadcast %cst_23 : f32 to vector<4x256xf32>
    %42 = arith.subf %35, %41 : vector<4x256xf32>
    %43 = arith.select %37, %40, %42 : vector<4x256xi1>, vector<4x256xf32>
    %cst_24 = arith.constant 0.000000e+00 : f32
    %44 = vector.shape_cast %13 : vector<1x256xi1> to vector<1x256xi1>
    %45 = vector.broadcast %44 : vector<1x256xi1> to vector<4x256xi1>
    %46 = vector.broadcast %cst_24 : f32 to vector<4x256xf32>
    %47 = arith.select %45, %43, %46 : vector<4x256xi1>, vector<4x256xf32>
    %48 = vector.shape_cast %47 : vector<4x256xf32> to vector<1x4x256xf32>
    %cst_25 = arith.constant dense<0.000000e+00> : vector<1xf32>
    %49 = vector.multi_reduction <add>, %48, %cst_25 [1, 2] : vector<1x4x256xf32> to vector<1xf32>
    %50 = vector.shape_cast %49 : vector<1xf32> to vector<1x1x1xf32>
    %51 = vector.extract %50[0, 0, 0] : f32 from vector<1x1x1xf32>
    %c0_26 = arith.constant 0 : index
    %c0_27 = arith.constant 0 : index
    %c0_28 = arith.constant 0 : index
    %52 = vector.load %arg3[%c0_26, %c0_27, %c0_28] : memref<1x2x256xf32, #tpu.memory_space<vmem>>, vector<1x2x256xf32>
    %53 = vector.shape_cast %52 : vector<1x2x256xf32> to vector<2x256xf32>
    %c0_29 = arith.constant 0 : index
    %c4_30 = arith.constant 4 : index
    %c0_31 = arith.constant 0 : index
    %54 = vector.load %arg5[%c0_29, %c4_30, %c0_31] : memref<1x8x256xf32, #tpu.memory_space<vmem>>, vector<1x2x256xf32>
    %55 = vector.shape_cast %54 : vector<1x2x256xf32> to vector<2x256xf32>
    %56 = arith.subf %53, %55 : vector<2x256xf32>
    %57 = math.absf %56 : vector<2x256xf32>
    %cst_32 = arith.constant 1.000000e+00 : f32
    %58 = vector.broadcast %cst_32 : f32 to vector<2x256xf32>
    %59 = arith.cmpf olt, %57, %58 : vector<2x256xf32>
    %cst_33 = arith.constant 5.000000e-01 : f32
    %60 = vector.broadcast %cst_33 : f32 to vector<2x256xf32>
    %61 = arith.mulf %60, %56 : vector<2x256xf32>
    %62 = arith.mulf %61, %56 : vector<2x256xf32>
    %cst_34 = arith.constant 5.000000e-01 : f32
    %63 = vector.broadcast %cst_34 : f32 to vector<2x256xf32>
    %64 = arith.subf %57, %63 : vector<2x256xf32>
    %65 = arith.select %59, %62, %64 : vector<2x256xi1>, vector<2x256xf32>
    %cst_35 = arith.constant 0.000000e+00 : f32
    %66 = vector.shape_cast %18 : vector<1x256xi1> to vector<1x256xi1>
    %67 = vector.broadcast %66 : vector<1x256xi1> to vector<2x256xi1>
    %68 = vector.broadcast %cst_35 : f32 to vector<2x256xf32>
    %69 = arith.select %67, %65, %68 : vector<2x256xi1>, vector<2x256xf32>
    %70 = vector.shape_cast %69 : vector<2x256xf32> to vector<1x2x256xf32>
    %cst_36 = arith.constant dense<0.000000e+00> : vector<1xf32>
    %71 = vector.multi_reduction <add>, %70, %cst_36 [1, 2] : vector<1x2x256xf32> to vector<1xf32>
    %72 = vector.shape_cast %71 : vector<1xf32> to vector<1x1x1xf32>
    %73 = vector.extract %72[0, 0, 0] : f32 from vector<1x1x1xf32>
    %c0_37 = arith.constant 0 : index
    %c0_38 = arith.constant 0 : index
    %c0_39 = arith.constant 0 : index
    %74 = vector.load %arg4[%c0_37, %c0_38, %c0_39] : memref<1x2x256xf32, #tpu.memory_space<vmem>>, vector<1x2x256xf32>
    %75 = vector.shape_cast %74 : vector<1x2x256xf32> to vector<2x256xf32>
    %c0_40 = arith.constant 0 : index
    %c6 = arith.constant 6 : index
    %c0_41 = arith.constant 0 : index
    %76 = vector.load %arg5[%c0_40, %c6, %c0_41] : memref<1x8x256xf32, #tpu.memory_space<vmem>>, vector<1x2x256xf32>
    %77 = vector.shape_cast %76 : vector<1x2x256xf32> to vector<2x256xf32>
    %78 = arith.subf %75, %77 : vector<2x256xf32>
    %79 = math.absf %78 : vector<2x256xf32>
    %cst_42 = arith.constant 1.000000e+00 : f32
    %80 = vector.broadcast %cst_42 : f32 to vector<2x256xf32>
    %81 = arith.cmpf olt, %79, %80 : vector<2x256xf32>
    %cst_43 = arith.constant 5.000000e-01 : f32
    %82 = vector.broadcast %cst_43 : f32 to vector<2x256xf32>
    %83 = arith.mulf %82, %78 : vector<2x256xf32>
    %84 = arith.mulf %83, %78 : vector<2x256xf32>
    %cst_44 = arith.constant 5.000000e-01 : f32
    %85 = vector.broadcast %cst_44 : f32 to vector<2x256xf32>
    %86 = arith.subf %79, %85 : vector<2x256xf32>
    %87 = arith.select %81, %84, %86 : vector<2x256xi1>, vector<2x256xf32>
    %cst_45 = arith.constant 0.000000e+00 : f32
    %88 = vector.shape_cast %18 : vector<1x256xi1> to vector<1x256xi1>
    %89 = vector.broadcast %88 : vector<1x256xi1> to vector<2x256xi1>
    %90 = vector.broadcast %cst_45 : f32 to vector<2x256xf32>
    %91 = arith.select %89, %87, %90 : vector<2x256xi1>, vector<2x256xf32>
    %92 = vector.shape_cast %91 : vector<2x256xf32> to vector<1x2x256xf32>
    %cst_46 = arith.constant dense<0.000000e+00> : vector<1xf32>
    %93 = vector.multi_reduction <add>, %92, %cst_46 [1, 2] : vector<1x2x256xf32> to vector<1xf32>
    %94 = vector.shape_cast %93 : vector<1xf32> to vector<1x1x1xf32>
    %95 = vector.extract %94[0, 0, 0] : f32 from vector<1x1x1xf32>
    %cst_47 = arith.constant 0.000000e+00 : f32
    %96 = vector.broadcast %cst_47 : f32 to vector<1x256xf32>
    %97 = arith.select %23, %29, %96 : vector<1x256xi1>, vector<1x256xf32>
    %98 = vector.shape_cast %97 : vector<1x256xf32> to vector<1x1x256xf32>
    %cst_48 = arith.constant dense<0.000000e+00> : vector<1xf32>
    %99 = vector.multi_reduction <add>, %98, %cst_48 [1, 2] : vector<1x1x256xf32> to vector<1xf32>
    %100 = vector.shape_cast %99 : vector<1xf32> to vector<1x1x1xf32>
    %101 = vector.extract %100[0, 0, 0] : f32 from vector<1x1x1xf32>
    %cst_49 = arith.constant 0.000000e+00 : f32
    %102 = vector.broadcast %cst_49 : f32 to vector<1x256xf32>
    %103 = arith.maximumf %25, %102 : vector<1x256xf32>
    %104 = arith.mulf %25, %27 : vector<1x256xf32>
    %105 = arith.subf %103, %104 : vector<1x256xf32>
    %106 = math.absf %25 : vector<1x256xf32>
    %cst_50 = arith.constant 0.000000e+00 : f32
    %107 = vector.broadcast %cst_50 : f32 to vector<1x256xf32>
    %108 = arith.subf %107, %106 : vector<1x256xf32>
    %109 = math.exp %108 : vector<1x256xf32>
    %cst_51 = arith.constant 1.000000e+00 : f32
    %110 = vector.broadcast %cst_51 : f32 to vector<1x256xf32>
    %111 = arith.addf %110, %109 : vector<1x256xf32>
    %112 = math.log %111 : vector<1x256xf32>
    %113 = arith.addf %105, %112 : vector<1x256xf32>
    %cst_52 = arith.constant 0.000000e+00 : f32
    %114 = vector.broadcast %cst_52 : f32 to vector<1x256xf32>
    %115 = arith.select %23, %113, %114 : vector<1x256xi1>, vector<1x256xf32>
    %116 = vector.shape_cast %115 : vector<1x256xf32> to vector<1x1x256xf32>
    %cst_53 = arith.constant dense<0.000000e+00> : vector<1xf32>
    %117 = vector.multi_reduction <add>, %116, %cst_53 [1, 2] : vector<1x1x256xf32> to vector<1xf32>
    %118 = vector.shape_cast %117 : vector<1xf32> to vector<1x1x1xf32>
    %119 = vector.extract %118[0, 0, 0] : f32 from vector<1x1x1xf32>
    %cst_54 = arith.constant 1.000000e+00 : f32
    %cst_55 = arith.constant 0.000000e+00 : f32
    %120 = vector.broadcast %cst_54 : f32 to vector<1x256xf32>
    %121 = vector.broadcast %cst_55 : f32 to vector<1x256xf32>
    %122 = arith.select %13, %120, %121 : vector<1x256xi1>, vector<1x256xf32>
    %123 = vector.shape_cast %122 : vector<1x256xf32> to vector<1x1x256xf32>
    %cst_56 = arith.constant dense<0.000000e+00> : vector<1xf32>
    %124 = vector.multi_reduction <add>, %123, %cst_56 [1, 2] : vector<1x1x256xf32> to vector<1xf32>
    %125 = vector.shape_cast %124 : vector<1xf32> to vector<1x1x1xf32>
    %126 = vector.extract %125[0, 0, 0] : f32 from vector<1x1x1xf32>
    %127 = tpu.iota {dimensions = array<i32: 0>} : vector<8x128xi32>
    %c0_57 = arith.constant 0 : index
    %c0_58 = arith.constant 0 : index
    %128 = vector.load %arg8[%c0_57, %c0_58] : memref<8x128xf32, #tpu.memory_space<vmem>>, vector<8x128xf32>
    %c0_i32_59 = arith.constant 0 : i32
    %129 = vector.broadcast %c0_i32_59 : i32 to vector<8x128xi32>
    %130 = arith.cmpi eq, %127, %129 : vector<8x128xi32>
    %c1_i32 = arith.constant 1 : i32
    %131 = vector.broadcast %c1_i32 : i32 to vector<8x128xi32>
    %132 = arith.cmpi eq, %127, %131 : vector<8x128xi32>
    %c2_i32 = arith.constant 2 : i32
    %133 = vector.broadcast %c2_i32 : i32 to vector<8x128xi32>
    %134 = arith.cmpi eq, %127, %133 : vector<8x128xi32>
    %c3_i32 = arith.constant 3 : i32
    %135 = vector.broadcast %c3_i32 : i32 to vector<8x128xi32>
    %136 = arith.cmpi eq, %127, %135 : vector<8x128xi32>
    %c4_i32 = arith.constant 4 : i32
    %137 = vector.broadcast %c4_i32 : i32 to vector<8x128xi32>
    %138 = arith.cmpi eq, %127, %137 : vector<8x128xi32>
    %c5_i32 = arith.constant 5 : i32
    %139 = vector.broadcast %c5_i32 : i32 to vector<8x128xi32>
    %140 = arith.cmpi eq, %127, %139 : vector<8x128xi32>
    %cst_60 = arith.constant 0.000000e+00 : f32
    %141 = vector.broadcast %126 : f32 to vector<8x128xf32>
    %142 = vector.broadcast %cst_60 : f32 to vector<8x128xf32>
    %143 = arith.select %140, %141, %142 : vector<8x128xi1>, vector<8x128xf32>
    %144 = vector.broadcast %119 : f32 to vector<8x128xf32>
    %145 = arith.select %138, %144, %143 : vector<8x128xi1>, vector<8x128xf32>
    %146 = vector.broadcast %95 : f32 to vector<8x128xf32>
    %147 = arith.select %136, %146, %145 : vector<8x128xi1>, vector<8x128xf32>
    %148 = vector.broadcast %73 : f32 to vector<8x128xf32>
    %149 = arith.select %134, %148, %147 : vector<8x128xi1>, vector<8x128xf32>
    %150 = vector.broadcast %101 : f32 to vector<8x128xf32>
    %151 = arith.select %132, %150, %149 : vector<8x128xi1>, vector<8x128xf32>
    %152 = vector.broadcast %51 : f32 to vector<8x128xf32>
    %153 = arith.select %130, %152, %151 : vector<8x128xi1>, vector<8x128xf32>
    %154 = arith.addf %128, %153 : vector<8x128xf32>
    %c0_61 = arith.constant 0 : index
    %c0_62 = arith.constant 0 : index
    %155 = vector.load %arg8[%c0_61, %c0_62] : memref<8x128xf32, #tpu.memory_space<vmem>>, vector<8x128xf32>
    tpu.vector_store %arg8[%c0_61, %c0_62], %154 {strides = array<i32>} : memref<8x128xf32, #tpu.memory_space<vmem>>, vector<8x128xf32>,
    %c0_63 = arith.constant 0 : index
    %c0_64 = arith.constant 0 : index
    %156 = vector.load %arg8[%c0_63, %c0_64] : memref<8x128xf32, #tpu.memory_space<vmem>>, vector<8x128xf32>
    %c0_65 = arith.constant 0 : index
    %c0_66 = arith.constant 0 : index
    %c0_67 = arith.constant 0 : index
    %157 = vector.load %arg7[%c0_65, %c0_66, %c0_67] : memref<1x8x128xf32, #tpu.memory_space<vmem>>, vector<1x8x128xf32>
    %158 = vector.shape_cast %157 : vector<1x8x128xf32> to vector<8x128xf32>
    %159 = vector.shape_cast %156 : vector<8x128xf32> to vector<1x8x128xf32>
    tpu.vector_store %arg7[%c0_65, %c0_66, %c0_67], %159 {strides = array<i32>} : memref<1x8x128xf32, #tpu.memory_space<vmem>>, vector<1x8x128xf32>,
    return
  }
  func.func @transform_0(%arg0: i32, %arg1: i32) -> (i32, i32, i32) {
    %c0_i32 = arith.constant 0 : i32
    %c0_i32_0 = arith.constant 0 : i32
    return %arg0, %c0_i32, %arg1 : i32, i32, i32
  }
  func.func @transform_1(%arg0: i32, %arg1: i32) -> (i32, i32, i32) {
    %c0_i32 = arith.constant 0 : i32
    %c0_i32_0 = arith.constant 0 : i32
    return %arg0, %c0_i32, %arg1 : i32, i32, i32
  }
  func.func @transform_2(%arg0: i32, %arg1: i32) -> (i32, i32, i32) {
    %c0_i32 = arith.constant 0 : i32
    %c0_i32_0 = arith.constant 0 : i32
    return %arg0, %c0_i32, %arg1 : i32, i32, i32
  }
  func.func @transform_3(%arg0: i32, %arg1: i32) -> (i32, i32, i32) {
    %c0_i32 = arith.constant 0 : i32
    %c0_i32_0 = arith.constant 0 : i32
    return %arg0, %c0_i32, %arg1 : i32, i32, i32
  }
  func.func @transform_4(%arg0: i32, %arg1: i32) -> (i32, i32, i32) {
    %c0_i32 = arith.constant 0 : i32
    %c0_i32_0 = arith.constant 0 : i32
    return %arg0, %c0_i32, %arg1 : i32, i32, i32
  }
  func.func @transform_5(%arg0: i32, %arg1: i32) -> (i32, i32, i32) {
    %c0_i32 = arith.constant 0 : i32
    %c0_i32_0 = arith.constant 0 : i32
    %c0_i32_1 = arith.constant 0 : i32
    return %arg0, %c0_i32, %c0_i32_0 : i32, i32, i32
  }
}

</mosaic_0001>

<bundles_post_ra>
// kernel: multibox_loss_offset.1
= control target key start
LH: loop header
LB: loop body
LE: loop exit
PB: predicated region body
PF: predicated region fallthrough
CT: control target
= control target key end

     0   :  { %s1111_s18 = smov 0   ;;  %s1113_s19 = smov 0   ;;  %s1290_s0 = inlined_call_operand.vmem [shape: f32[2,4,640], index: 0, kind: input, shape index: {}]   ;;  %s1291_s1 = inlined_call_operand.vmem [shape: f32[2,2,640], index: 1, kind: input, shape index: {}]   ;;  %s1292_s2 = inlined_call_operand.vmem [shape: f32[2,2,640], index: 2, kind: input, shape index: {}]   ;;  %s1293_s3 = inlined_call_operand.vmem [shape: f32[2,8,640], index: 3, kind: input, shape index: {}]   ;;  %s1294_s4 = inlined_call_operand.vmem [shape: f32[2,6,640], index: 4, kind: input, shape index: {}]   ;;  %s1295_s5 = inlined_call_operand.vmem [shape: f32[2,8,128], index: 5, kind: output, shape index: {}]  }
   0x1   :  { %s1115_s20 = smov 0   ;;  %s1117_s21 = smov 0  }
   0x2   :  { %s1119_s22 = smov 0  }
   0x3 LB: > { %s24_s23 = sadd.s32 1, %s1066_s20  ;;  %s27_s24 = sadd.s32 1, %s1070_s21  ;;  %s1074_s22 = sphi %s1119_s22, %s15_s22   ;;  %s1070_s21 = sphi %s1117_s21, %s1309_s21   ;;  %s1066_s20 = sphi %s1115_s20, %s1308_s20   ;;  %s1062_s19 = sphi %s1113_s19, %s1307_s19   ;;  %s1058_s18 = sphi %s1111_s18, %s1306_s18  }
   0x4   : > { %p25_p0 = scmp.ge.s32.totalorder %s24_s23, 3  ;;  %p947_p1 = scmp.ge.s32.totalorder %s1074_s22, 1 }
   0x5   : > { %p314_p2 = scmp.lt.s32.totalorder %s1074_s22, 7 }
   0x6   : > { %s1311_s23 = smov (%p25_p0, %s24_s23), 0  ;;  %s1313_s24 = smov (!%p25_p0, %s27_s24), %s1070_s21 }
   0x7   : > { %p315_p3 = pnand %p947_p1, %p314_p2  ;;  %p29_p4 = scmp.ge.s32.totalorder %s1313_s24, 2 }
   0x8   : > { %s948_s25 = sshll.u32 (!%p315_p3), %s1058_s18, 1  ;;  %p406_p5 = scmp.lt.s32.totalorder (!%p315_p3), %s1062_s19, 1 }
   0x9   : > { %s1315_s24 = smov (%p29_p4, %s1313_s24), 0  ;;  %318 = sbr.rel (%p315_p3) target bundleno = 289 (0x121), region = 40 }
   0xa   : > { %p408_p6 = scmp.lt.s32.totalorder (!%p315_p3), %s948_s25, 4  ;;  %p959_p7 = scmp.ne.s32.totalorder (!%p315_p3), %s1058_s18, 0 }
  0x10   : > { %s1317_s19 = smov (!%p406_p5, %s1062_s19), 1  ;;  %s1319_s25 = smov (!%p408_p6, %s948_s25), 4 }
  0x11   : > { %s971_s26 = smul.u32 5, %s1317_s19  ;;  %s958_s27 = sshll.u32 %s1317_s19, 3  ;;  %v1076_v0 = vmov (!%p959_p7), 0.0  }
  0x12   : > { %s1147_s30 = scalar_lea.vmem %s1295_s5, %s958_s27  ;;  %498 = sbr.rel (%p959_p7) target bundleno = 25 (0x19), region = 44  ;;  %499 = vst [vmem:[#allocation2] sm:$0xff] (!%p959_p7), %v1076_v0 }
  0x13   : > { %s411_s6 = sadd.s32 %s971_s26, %s1319_s25 }
  0x14   : > { %s949_s7 = sshll.u32 %s411_s6, 2  ;;  %s951_s8 = sshll.u32 %s411_s6, 1 }
  0x15   : > { %s413_s11 = scalar_lea.vmem %s1290_s0, %s949_s7  ;;  %s1155_s14 = scalar_lea.vmem %s1291_s1, %s951_s8 }
  0x16   : > { %s1160_s17 = scalar_lea.vmem %s1292_s2, %s951_s8  ;;  %s955_s19 = sshll.u32 %s411_s6, 3 }
  0x17   : > { %s1165_s25 = scalar_lea.vmem %s1293_s3, %s955_s19  ;;  %s1170_s7 = scalar_lea.vmem %s1294_s4, %s955_s19 }
  0x19 PF: > { %v500_v1 = vlaneseq  ;;  %s960_s6 = sshll.u32 %s1058_s18, 8  ;;  %v1077_v3 = vmov 1966171168   ;;  %v544_v6 = vld [vmem:[%s413_s11] sm:$0xff]  ;;  %v1078_v14 = vmov 0   ;;  %vm704_vm8 = vcmask 1040384  }
  0x1a   : > { %v504_v2 = vstv %s960_s6  ;;  %v515_v4 = vunpack.c.l.s4 %v1077_v3  ;;  %v1029_v11 = vld [vmem:[%s1165_s25] ss:$8 sps:$4 sm:$0xff]   ;;  %v1079_v16 = vmov 1983009808   ;;  %vm574_vm9 = vcmask 1043456  }
  0x1b   : > { %v501_v5 = vand.u32 127, %v500_v1  ;;  %v1174_v10 = vshrl.u32 %v500_v1, 7  ;;  %v551_v13 = vsub.f32 %v544_v6, %v1029_v11  ;;  %v594_v17 = vunpack.c.l.s4 %v1079_v16  ;;  %v1030_v18 = vld [vmem:[%s1165_s25 + $0x4] ss:$8 sps:$4 sm:$0xcc]  }
  0x1c   : > { %v516_v9 = vunpack.c.0.s8 %v515_v4  ;;  %v962_v25 = vld [vmem:[%s1170_s7 + $0x2] ss:$8 sm:$0x3]  ;;  %v1031_v26 = vld [vmem:[%s1165_s25 + $0x4] ss:$8 sps:$4 sm:$0x33]  }
  0x1d   : > { %v502_v7 = vadd.s32 128, %v501_v5  ;;  %v505_v8 = vadd.s32 %v504_v2, %v501_v5  ;;  %v552_v20 = vand.u32 2147483647, %v551_v13  ;;  %v554_v21 = vmul.f32 0.5, %v551_v13  ;;  %v587_v33 = vld [vmem:[%s1155_s14] sm:$0xf] }
  0x1e   : > { %v519_v19 = vsub.s32 %v516_v9, %v1174_v10  ;;  %v595_v23 = vunpack.c.0.s8 %v594_v17  ;;  %v1185_v30 = vld [vmem:[%s1170_s7 + $0x3] ss:$8 sm:$0x3]  ;;  %v509_v32 = vld [vmem:[%s1170_s7] ss:$8 sm:$0x3] }
  0x1f   : > { %v506_v12 = vadd.s32 %v504_v2, %v502_v7  ;;  %vm507_vm0 = vcmp.lt.s32.totalorder %v505_v8, 640  ;;  %v555_v27 = vmul.f32 %v554_v21, %v551_v13  ;;  %v966_v28 = vadd.f32 -0.5, %v552_v20  ;;  %v961_v34 = vld [vmem:[%s1170_s7 + $0x1] ss:$8 sm:$0x3] }
  0x20   : > { %v511_v15 = vsel %vm507_vm0, 1, %v1078_v14  ;;  %v1182_v29 = vsub.s32 %v595_v23, %v1174_v10  ;;  %vm553_vm2 = vcmp.lt.f32.partialorder %v552_v20, 1.0  ;;  %v720_v37 = vand.u32 2147483647, %v1185_v30  ;;  %v645_v39 = vld [vmem:[%s1160_s17] sm:$0xf] }
  0x21   : > { %vm508_vm1 = vcmp.lt.s32.totalorder %v506_v12, 640  ;;  %vm536_vm3 = vcmp.gt.f32.partialorder %v962_v25, 0.0  ;;  %v965_v40 = vld [vmem:[%s1170_s7 + $0x5] ss:$8 sm:$0x3]  ;;  %vm510_vm4 = vcmp.gt.f32.partialorder %v509_v32, 0.0  ;;  %v557_v41 = vsel %vm553_vm2, %v555_v27, %v966_v28 }
  0x22   : > { %v512_v22 = vsel %vm508_vm1, 1, %v1078_v14  ;;  %v657_v35 = vrot.slane %v1030_v18, %v1182_v29  ;;  %v599_v36 = vrot.slane %v1031_v26, %v1182_v29  ;;  %v1200_v45 = vsub.s32 0, %v1174_v10 }
  0x23   : > { %v513_v24 = vcombine.low %v511_v15, %v512_v22  ;;  %v1203_v46 = vsub.s32 1, %v1174_v10  ;;  %vm532_vm6 = vcmp.gt.f32.partialorder %v961_v34, 0.0  ;;  %v721_v49 = vsub.f32 0.0, %v720_v37 }
  0x24   : > { %v658_v42 = vcombine.high %v657_v35, %v657_v35  ;;  %v601_v43 = vsub.f32 %v587_v33, %v599_v36  ;;  %v570_v52 = vcombine.high %v557_v41, %v557_v41  ;;  %v1080_v18 = vmov 0.0  }
  0x25   : > { %v520_v31 = vrot.slane %v513_v24, %v519_v19  ;;  %v722_v1 = vmul.f32 1.442695, %v721_v49  ;;  %vm632_vm1 = vcmask 1041408   ;;  %v717_v44 = vmax.f32 %v1185_v30, 0.0 }
  0x26   : > { %v660_v48 = vsub.f32 %v645_v39, %v658_v42  ;;  %v602_v53 = vand.u32 2147483647, %v601_v43  ;;  %v604_v0 = vmul.f32 0.5, %v601_v43 }
  0x27   : > { %v527_v38 = vrot.slane %v520_v31, %v519_v19  ;;  %1032 = vpow2.f32 %v722_v1 }
  0x28   : > { %v661_v57 = vand.u32 2147483647, %v660_v48  ;;  %v663_v61 = vmul.f32 0.5, %v660_v48  ;;  %vm603_vm15 = vcmp.lt.f32.partialorder %v602_v53, 1.0  ;;  %v967_v15 = vadd.f32 -0.5, %v602_v53 }
  0x29   : > { %vm1195_vm5 = vcmp.ne.s32.totalorder %v527_v38, 0 }
  0x2a   : > { %vm1207_vm7 = vmand %vm536_vm3, %vm1195_vm5  ;;  %vm1231_vm14 = vcmp.lt.f32.partialorder %v661_v57, 1.0  ;;  %v664_v11 = vmul.f32 %v663_v61, %v660_v48  ;;  %v968_v12 = vadd.f32 -0.5, %v661_v57  ;;  %vm784_vm3 = vcmp.eq.s32.totalorder %v1174_v10, 5 }
  0x2b   : > { %v692_v50 = vsel %vm1207_vm7, %v965_v40, 0.0  ;;  %vm1215_vm10 = vmand %vm510_vm4, %vm1195_vm5  ;;  %vm783_vm4 = vcmp.eq.s32.totalorder %v1174_v10, 4 }
  0x2c   : > { %v697_v54 = vrot.slane %v692_v50, %v1200_v45  ;;  %v701_v55 = vrot.slane %v692_v50, %v1203_v46  ;;  %v558_v56 = vsel %vm1215_vm10, 1, %v1078_v14  ;;  %vm533_vm11 = vmand %vm532_vm6, %vm1195_vm5  ;;  %v666_v17 = vsel %vm1231_vm14, %v664_v11, %v968_v12 }
  0x2d   : > { %v562_v58 = vrot.slane %v558_v56, %v1200_v45  ;;  %v566_v59 = vrot.slane %v558_v56, %v1203_v46  ;;  %v608_v60 = vsel %vm533_vm11, 1, %v1078_v14  ;;  %v605_v14 = vmul.f32 %v604_v0, %v601_v43  ;;  %v964_v43 = vld [vmem:[%s1170_s7 + $0x4] ss:$8 sm:$0x3] }
  0x2e   : > { %v705_v62 = vsel %vm704_vm8, %v697_v54, 0.0  ;;  %v706_v63 = vsel %vm704_vm8, %v701_v55, 0.0  ;;  %v612_v3 = vrot.slane %v608_v60, %v1200_v45  ;;  %v616_v6 = vrot.slane %v608_v60, %v1203_v46 }
  0x2f   : > { %v707_v2 = vadd.f32 %v706_v63, %v705_v62  ;;  %vm567_vm12 = vcmp.eq.s32.totalorder %v562_v58, 1  ;;  %vm568_vm13 = vcmp.eq.s32.totalorder %v566_v59, 1  ;;  %v752_v19 = vsel %vm1215_vm10, 1.0, %v1080_v18 }
  0x30   : > { %v572_v4 = vsel %vm567_vm12, %v557_v41, 0.0  ;;  %v573_v5 = vsel %vm568_vm13, %v570_v52, 0.0  ;;  %vm1237_vm0 = vcmp.eq.s32.totalorder %v612_v3, 1  ;;  %v674_v20 = vrot.slane %v666_v17, %v1182_v29 }
  0x31   : > { %708 = vadd.xlane.f32.xlu1 %v707_v2  ;;  %v575_v8 = vsel %vm574_vm9, %v572_v4, 0.0  ;;  %v576_v9 = vsel %vm574_vm9, %v573_v5, 0.0  ;;  %v607_v21 = vsel %vm603_vm15, %v605_v14, %v967_v15  ;;  %vm618_vm2 = vcmp.eq.s32.totalorder %v616_v6, 1  ;;  %v1033_v41 = vpop.eup %1032 }
  0x32   : > { %v577_v13 = vadd.f32 %v576_v9, %v575_v8  ;;  %v626_v22 = vrot.slane %v607_v21, %v1182_v29  ;;  %v757_v23 = vrot.slane %v752_v19, %v1200_v45  ;;  %v761_v24 = vrot.slane %v752_v19, %v1203_v46 }
  0x33   : > { %v675_v25 = vcombine.high %v674_v20, %v674_v20  ;;  %v678_v26 = vsel %vm1237_vm0, %v674_v20, 0.0  ;;  %v724_v42 = vadd.f32 1.0, %v1033_v41  ;;  %v718_v48 = vmul.f32 %v964_v43, %v1185_v30  ;;  %v778_v43 = vld [vmem:[#allocation2] sm:$0xff] }
  0x34   : > { %578 = vadd.xlane.f32.xlu0 %v577_v13  ;;  %v680_v27 = vsel %vm632_vm1, %v678_v26, 0.0  ;;  %v627_v28 = vcombine.high %v626_v22, %v626_v22  ;;  %v630_v31 = vsel %vm1237_vm0, %v626_v22, 0.0  ;;  %v764_v35 = vsel %vm704_vm8, %v757_v23, 0.0 }
  0x35   : > { %v679_v32 = vsel %vm618_vm2, %v675_v25, 0.0  ;;  %v633_v33 = vsel %vm632_vm1, %v630_v31, 0.0  ;;  %v765_v36 = vsel %vm704_vm8, %v761_v24, 0.0  ;;  %1034 = vlog2.f32 %v724_v42 }
  0x36   : > { %v681_v29 = vsel %vm632_vm1, %v679_v32, 0.0  ;;  %v631_v34 = vsel %vm618_vm2, %v627_v28, 0.0  ;;  %v766_v40 = vadd.f32 %v765_v36, %v764_v35  ;;  %v719_v49 = vsub.f32 %v717_v44, %v718_v48 }
  0x37   : > { %v682_v37 = vadd.f32 %v681_v29, %v680_v27  ;;  %v634_v38 = vsel %vm632_vm1, %v631_v34, 0.0  ;;  %vm782_vm5 = vcmp.eq.s32.totalorder %v1174_v10, 3  ;;  %vm781_vm6 = vcmp.eq.s32.totalorder %v1174_v10, 2 }
  0x38   : > { %v635_v39 = vadd.f32 %v634_v38, %v633_v33 }
  0x39   : > { %683 = vadd.xlane.f32.xlu1 %v682_v37 }
  0x3a   : > { %636 = vadd.xlane.f32.xlu0 %v635_v39 }
  0x3d   : > { %767 = vadd.xlane.f32.xlu1 %v766_v40 }
  0x3f   : > { %v1035_v50 = vpop.eup %1034 }
  0x40   : > { %v726_v51 = vmul.f32 0.6931472, %v1035_v50 }
  0x42   : > { %v727_v52 = vadd.f32 %v726_v51, %v719_v49 }
  0x44   : > { %v728_v53 = vsel %vm1207_vm7, %v727_v52, 0.0  ;;  %vm780_vm7 = vcmp.eq.s32.totalorder %v1174_v10, 1 }
  0x45   : > { %v733_v54 = vrot.slane %v728_v53, %v1200_v45  ;;  %v737_v55 = vrot.slane %v728_v53, %v1203_v46 }
  0x47   : > { %v740_v56 = vsel %vm704_vm8, %v733_v54, 0.0  ;;  %v741_v57 = vsel %vm704_vm8, %v737_v55, 0.0  ;;  %vm779_vm8 = vcmp.eq.s32.totalorder %v1174_v10, 0 }
  0x48   : > { %v742_v58 = vadd.f32 %v741_v57, %v740_v56 }
  0x4a   : > { %743 = vadd.xlane.f32.xlu0 %v742_v58 }
  0xbe   : > { %v709_v59 = vpop.xlane.xlu1 %708 }
  0xbf   : > { %v710_v61 = vrot.slane %v709_v59, 4 }
  0xc1   : > { %v579_v60 = vpop.xlane.xlu0 %578  ;;  %v711_v0 = vadd.f32 %v710_v61, %v709_v59 }
  0xc2   : > { %v580_v30 = vrot.slane %v579_v60, 4 }
  0xc3   : > { %v712_v4 = vrot.slane %v711_v0, 2 }
  0xc4   : > { %v581_v62 = vadd.f32 %v580_v30, %v579_v60 }
  0xc5   : > { %v713_v11 = vadd.f32 %v712_v4, %v711_v0 }
  0xc6   : > { %v582_v63 = vrot.slane %v581_v62, 2  ;;  %v684_v47 = vpop.xlane.xlu1 %683 }
  0xc7   : > { %v685_v2 = vrot.slane %v684_v47, 4  ;;  %v637_v3 = vpop.xlane.xlu0 %636  ;;  %v714_v16 = vrot.slane %v713_v11, 1 }
  0xc8   : > { %v583_v1 = vadd.f32 %v582_v63, %v581_v62  ;;  %v638_v46 = vrot.slane %v637_v3, 4 }
  0xc9   : > { %v686_v5 = vadd.f32 %v685_v2, %v684_v47  ;;  %v715_v20 = vadd.f32 %v714_v16, %v713_v11 }
  0xca   : > { %v584_v45 = vrot.slane %v583_v1, 1  ;;  %v639_v7 = vadd.f32 %v638_v46, %v637_v3  ;;  %v768_v19 = vpop.xlane.xlu1 %767 }
  0xcb   : > { %v687_v8 = vrot.slane %v686_v5, 2  ;;  %v769_v21 = vrot.slane %v768_v19, 4 }
  0xcc   : > { %v585_v6 = vadd.f32 %v584_v45, %v583_v1  ;;  %v640_v9 = vrot.slane %v639_v7, 2 }
  0xcd   : > { %v688_v12 = vadd.f32 %v687_v8, %v686_v5  ;;  %v770_v22 = vadd.f32 %v769_v21, %v768_v19 }
  0xce   : > { %972 = vpush %v585_v6  ;;  %v641_v13 = vadd.f32 %v640_v9, %v639_v7 }
  0xcf   : > { %v689_v14 = vrot.slane %v688_v12, 1  ;;  %v771_v23 = vrot.slane %v770_v22, 2 }
  0xd0   : > { %v642_v15 = vrot.slane %v641_v13, 1 }
  0xd1   : > { %v690_v17 = vadd.f32 %v689_v14, %v688_v12  ;;  %v772_v27 = vadd.f32 %v771_v23, %v770_v22 }
  0xd2   : > { %v643_v18 = vadd.f32 %v642_v15, %v641_v13 }
  0xd3   : > { %v773_v32 = vrot.slane %v772_v27, 1 }
  0xd4   : > { %974 = vpush %v643_v18 }
  0xd5   : > { %976 = vpush %v690_v17  ;;  %v774_v34 = vadd.f32 %v773_v32, %v772_v27 }
  0xd6   : > { %978 = vpush %v715_v20 }
  0xd7   : > { %v744_v24 = vpop.xlane.xlu0 %743 }
  0xd8   : > { %v745_v25 = vrot.slane %v744_v24, 4 }
  0xda   : > { %v746_v26 = vadd.f32 %v745_v25, %v744_v24 }
  0xdc   : > { %v747_v28 = vrot.slane %v746_v26, 2 }
  0xde   : > { %v748_v31 = vadd.f32 %v747_v28, %v746_v26 }
  0xe0   : > { %v749_v33 = vrot.slane %v748_v31, 1 }
  0xe2   : > { %v750_v29 = vadd.f32 %v749_v33, %v748_v31 }
  0xe4   : > { %980 = vpush %v750_v29 }
  0xe5   : > { %982 = vpush %v774_v34 }
  0xff   : > { %s973_s18 = spop %972 }
 0x100   : > { %v795_v48 = vstv %s973_s18 }
 0x105   : > { %s975_s8 = spop %974 }
 0x106   : > { %s977_s9 = spop %976  ;;  %v791_v40 = vstv %s975_s8 }
 0x107   : > { %s979_s10 = spop %978  ;;  %v789_v38 = vstv %s977_s9 }
 0x108   : > { %v793_v42 = vstv %s979_s10 }
 0x115   : > { %s981_s11 = spop %980 }
 0x116   : > { %v787_v35 = vstv %s981_s11  ;;  %s983_s12 = spop %982 }
 0x117   : > { %v785_v36 = vstv %s983_s12 }
 0x118   : > { %v786_v37 = vsel %vm784_vm3, %v785_v36, 0.0 }
 0x119   : > { %v788_v39 = vsel %vm783_vm4, %v787_v35, %v786_v37 }
 0x11a   : > { %v790_v41 = vsel %vm782_vm5, %v789_v38, %v788_v39 }
 0x11b   : > { %v792_v44 = vsel %vm781_vm6, %v791_v40, %v790_v41 }
 0x11c   : > { %v794_v49 = vsel %vm780_vm7, %v793_v42, %v792_v44 }
 0x11d   : > { %v796_v50 = vsel %vm779_vm8, %v795_v48, %v794_v49 }
 0x11e   : > { %v797_v51 = vadd.f32 %v796_v50, %v778_v43 }
 0x120   : > { %798 = vst [vmem:[#allocation2] sm:$0xff] %v797_v51  ;;  %800 = vst [vmem:[%s1147_s30] sm:$0xff] %v797_v51 }
 0x121 PF: > { %s15_s22 = sadd.s32 1, %s1074_s22   ;;  %s1306_s18 = smov %s1066_s20 }
 0x122   : > { %p12_p8 = scmp.ge.s32.totalorder %s15_s22, 8   ;;  %s1307_s19 = smov %s1070_s21 }
 0x123   : > { %s1308_s20 = smov %s1311_s23  ;;  %s1309_s21 = smov %s1315_s24 }
 0x124   :  { %14 = sbr.rel (!%p12_p8) target bundleno = 3 (0x3), region = 91 }

</bundles_post_ra>
